<compile_context>
chip_gen: v6e
topology: v6e:2x2x1
jax: 0.10.0
libtpu: 0.0.40
codegen_flags: <defaults>
</compile_context>

<pallas_src>
import functools

import jax
import jax.numpy as jnp
from jax.experimental import pallas as pl
from jax.experimental.pallas import tpu as pltpu


# ----------------------------------------------------------------------------
# Kernel
# ----------------------------------------------------------------------------
def _ffn_kernel(x_ref, w1_ref, w3_ref, w2_ref, o_ref, acc_ref):
    """One (row-tile, d_ff-tile) grid step of the SwiGLU FFN.

    x_ref:   (tm, D)        input rows (compute dtype)
    w1_ref:  (D, t_ff)      gate-projection weight tile
    w3_ref:  (D, t_ff)      up-projection weight tile
    w2_ref:  (t_ff, D)      down-projection weight tile
    o_ref:   (tm, D)        output rows
    acc_ref: (tm, D) f32    accumulator, resident across the d_ff grid axis
    """
    j = pl.program_id(1)

    x = x_ref[...]
    # Gate and up projections; both dots share the same LHS, f32 MXU accumulation.
    h1 = jnp.dot(x, w1_ref[...], preferred_element_type=jnp.float32)
    h3 = jnp.dot(x, w3_ref[...], preferred_element_type=jnp.float32)

    # SiLU(h1) * h3 in f32 (VPU mul + EUP sigmoid).
    gated = (h1 * jax.nn.sigmoid(h1)) * h3

    # Partial down-projection for this d_ff tile.
    partial = jnp.dot(gated.astype(w2_ref.dtype), w2_ref[...],
                      preferred_element_type=jnp.float32)

    # j==0 writes the accumulator directly (saves a zero-fill store + a read of
    # zeros per row tile); later d_ff tiles accumulate.
    @pl.when(j == 0)
    def _init():
        acc_ref[...] = partial

    @pl.when(j > 0)
    def _accum():
        acc_ref[...] += partial

    @pl.when(j == pl.num_programs(1) - 1)
    def _finalize():
        o_ref[...] = acc_ref[...].astype(o_ref.dtype)


# ----------------------------------------------------------------------------
# Tiling heuristics
# ----------------------------------------------------------------------------
def _round_up(x, m):
    return ((x + m - 1) // m) * m


def _hw_defaults():
    """(row_target, vmem_limit_bytes) derived from the local TPU generation."""
    kind = ""
    try:
        kind = jax.devices()[0].device_kind.lower()
    except Exception:
        pass
    vmem_cap = None
    try:
        vmem_cap = int(pltpu.get_tpu_info().vmem_capacity_bytes)
    except Exception:
        vmem_cap = None
    if vmem_cap is None:
        if "v7" in kind:
            vmem_cap = 64 << 20
        elif ("v4" in kind) or ("v5" in kind) or ("v6" in kind):
            vmem_cap = 128 << 20
        else:
            vmem_cap = 64 << 20            # conservative for unknown chips
    # Never claim the whole per-core VMEM; leave ~18% for Mosaic internal scratch.
    vmem_limit = min(110 << 20, int(vmem_cap * 0.82))

    # Weights are re-streamed once per row tile, so arithmetic intensity per
    # weight byte ~= block_rows: target ~ peak_TFLOPs / HBM_BW per generation.
    if "v6" in kind:
        row_target = 1024                  # v6e roofline needs ~640+ rows
    elif "v7" in kind:
        row_target = 512                   # v7x roofline ~320 rows (3.2 TB/s)
    elif "v5" in kind:
        row_target = 768                   # v5e roofline ~240 rows
    else:
        row_target = 512
    return row_target, vmem_limit


def _vmem_step_bytes(tm, t_ff, D, bw):
    """VMEM bytes of one grid step: double-buffered blocks + acc + f32 temps."""
    dbl = 2
    blocks = dbl * bw * (tm * D            # x
                         + 2 * D * t_ff    # w1 + w3
                         + t_ff * D        # w2
                         + tm * D)         # out
    acc = tm * D * 4
    temps = 3 * tm * t_ff * 4 + tm * t_ff * bw   # h1, h3, gated (f32) + cast copy
    return blocks + acc + temps


def _tff_candidates(d_ff_p, cap=512):
    """128-aligned divisors of (padded) d_ff, descending, capped at `cap`."""
    if d_ff_p <= 128:
        return [d_ff_p]
    cands = []
    t = (min(cap, d_ff_p) // 128) * 128
    while t >= 128:
        if d_ff_p % t == 0:
            cands.append(t)
        t -= 128
    return cands or [d_ff_p]


# ----------------------------------------------------------------------------
# Wrapper
# ----------------------------------------------------------------------------
@functools.partial(jax.jit, static_argnames=("block_rows", "t_ff", "compute_dtype"))
def ffn_pallas(x, w1, w3, w2, *, block_rows=None, t_ff=None,
               compute_dtype=jnp.bfloat16):
    """SwiGLU FFN: (silu(x @ w1) * (x @ w3)) @ w2.

    Args:
      x:  (batch, seq, d_model)
      w1: (d_model, d_ff)   -- transpose of torch w1.weight
      w3: (d_model, d_ff)   -- transpose of torch w3.weight
      w2: (d_ff, d_model)   -- transpose of torch w2.weight
      block_rows: row tile; chosen generation-aware if None.
      t_ff: d_ff tile width; chosen (and padded if needed) automatically if None.
      compute_dtype: MXU operand dtype (default bf16; accumulation and the
        SiLU/gate math stay f32). None keeps the input dtype. Store weights in
        this dtype at rest so the per-call cast below is a no-op.
    Returns:
      (batch, seq, d_model) in the compute dtype.
    """
    B, S, D = x.shape
    d_ff = w1.shape[1]
    assert w1.shape == (D, d_ff) and w3.shape == (D, d_ff) and w2.shape == (d_ff, D)

    cdt = jnp.dtype(x.dtype) if compute_dtype is None else jnp.dtype(compute_dtype)

    def _cast(a):
        return a if a.dtype == cdt else a.astype(cdt)

    x, w1, w3, w2 = _cast(x), _cast(w1), _cast(w3), _cast(w2)

    N = B * S
    x2d = x.reshape(N, D)
    bw = cdt.itemsize
    sub = 8 if bw >= 4 else 16            # f32 sublane tile 8, bf16 packs 16

    row_target, vmem_limit = _hw_defaults()
    vmem_budget = int(vmem_limit * 0.9)

    # --- d_ff tiling (zero-pad to a 128-aligned tiling if necessary) -------
    d_ff_p = d_ff
    if t_ff is not None and (d_ff % t_ff != 0 or (t_ff != d_ff and t_ff % 128 != 0)):
        t_ff = None                        # invalid request -> auto
    if t_ff is None:
        if d_ff > 128 and d_ff % 128 != 0:
            d_ff_p = _round_up(d_ff, 128)
        cands = _tff_candidates(d_ff_p)
    else:
        cands = [t_ff]

    # --- row tiling ---------------------------------------------------------
    def _auto_rows(tff):
        if N <= sub:
            return N
        if N <= row_target:
            # >=2 row tiles when possible (pipelining + megacore sharding).
            br = min(N, _round_up(pl.cdiv(N, 2), sub))
        else:
            br = max(sub, (row_target // sub) * sub)
        while br > sub and _vmem_step_bytes(br, tff, D, bw) > vmem_budget:
            br = max(sub, ((br - 1) // sub) * sub)
        return br

    if block_rows is None:
        # Prefer the (t_ff, block_rows) pair with the largest row tile: arithmetic
        # intensity per weight byte ~ block_rows.
        best = None
        for tff in cands:
            br = _auto_rows(tff)
            if best is None or br > best[1]:
                best = (tff, br)
        t_ff, block_rows = best
        # Prefer an even number of row tiles (v7x megacore load balance).
        nr = pl.cdiv(N, block_rows)
        if nr > 1 and nr % 2 == 1:
            alt = min(N, _round_up(pl.cdiv(N, nr + 1), sub))
            if alt >= sub and pl.cdiv(N, alt) % 2 == 0:
                block_rows = alt
    else:
        block_rows = min(block_rows, N)
        if block_rows != N:
            block_rows = max(sub, (block_rows // sub) * sub)
        if t_ff is None:
            t_ff = cands[0]

    n_rows = pl.cdiv(N, block_rows)
    n_ff = d_ff_p // t_ff

    # Zero-pad weights along d_ff if padding was chosen (padded gate columns give
    # silu(0)*0 = 0 and padded w2 rows are zero, so the result is unchanged).
    if d_ff_p != d_ff:
        pad = d_ff_p - d_ff
        w1 = jnp.pad(w1, ((0, 0), (0, pad)))
        w3 = jnp.pad(w3, ((0, 0), (0, pad)))
        w2 = jnp.pad(w2, ((0, pad), (0, 0)))

    cost = pl.CostEstimate(
        flops=6 * N * D * d_ff_p,                      # 2*N*D*2d_ff + 2*N*d_ff*D
        transcendentals=N * d_ff_p,                    # sigmoid
        # Weights re-streamed once per row tile; activations read + written once.
        bytes_accessed=2 * N * D * bw + n_rows * 3 * D * d_ff_p * bw,
    )

    # TODO(synk): if d_model is not a multiple of 128, pad D in the wrapper for
    # lane-dense stores; current code is correct (full-D blocks) but uses masked
    # stores for sub-128 D.
    # TODO(synk): v7x inference could use fp8 weight operands (per-channel scales
    # applied in the f32 epilogue); needs a quantization/accuracy pass.
    out2d = pl.pallas_call(
        _ffn_kernel,
        out_shape=jax.ShapeDtypeStruct((N, D), cdt),
        grid_spec=pltpu.PrefetchScalarGridSpec(
            num_scalar_prefetch=0,
            grid=(n_rows, n_ff),                        # reduction (d_ff) axis last
            in_specs=[
                pl.BlockSpec((block_rows, D), lambda i, j: (i, 0)),   # x rows
                pl.BlockSpec((D, t_ff), lambda i, j: (0, j)),         # w1 tile
                pl.BlockSpec((D, t_ff), lambda i, j: (0, j)),         # w3 tile
                pl.BlockSpec((t_ff, D), lambda i, j: (j, 0)),         # w2 tile
            ],
            out_specs=pl.BlockSpec((block_rows, D), lambda i, j: (i, 0)),
            scratch_shapes=[pltpu.VMEM((block_rows, D), jnp.float32)],
        ),
        compiler_params=pltpu.CompilerParams(
            dimension_semantics=("parallel", "arbitrary"),
            vmem_limit_bytes=vmem_limit,
        ),
        cost_estimate=cost,
    )(x2d, w1, w3, w2)

    return out2d.reshape(B, S, D)


def ffn_reference(x, w1, w3, w2):
    h1 = x @ w1
    h3 = x @ w3
    return (jax.nn.silu(h1) * h3) @ w2


if __name__ == "__main__":
    # Small, lane-aligned shapes consistent with the module: x (batch, seq, d_model).
    batch, seq, d_model, d_ff = 2, 8, 128, 256

    key = jax.random.PRNGKey(0)
    kx, k1, k2, k3, k4, k5 = jax.random.split(key, 6)

    x = jax.random.normal(kx, (batch, seq, d_model), dtype=jnp.float32)
    # Deterministic "Linear" weights, stored as (in, out).
    w1 = jax.random.normal(k1, (d_model, d_ff), dtype=jnp.float32) * (d_model ** -0.5)
    w3 = jax.random.normal(k3, (d_model, d_ff), dtype=jnp.float32) * (d_model ** -0.5)
    w2 = jax.random.normal(k2, (d_ff, d_model), dtype=jnp.float32) * (d_ff ** -0.5)

    ref = ffn_reference(x, w1, w3, w2)

    # f32 path with explicit tiling: 2 row tiles x 2 d_ff tiles (exercises the
    # accumulator init / accumulate / finalize phases).
    out = ffn_pallas(x, w1, w3, w2, block_rows=8, t_ff=128,
                     compute_dtype=jnp.float32)
    out = jax.block_until_ready(out)
    assert out.shape == (batch, seq, d_model)
    assert jnp.allclose(out, ref, atol=2e-5, rtol=2e-5), "f32 mismatch vs reference"

    # Default production path: bf16 MXU operands, f32 accumulation, auto tiling.
    out_bf16 = ffn_pallas(x, w1, w3, w2)
    out_bf16 = jax.block_until_ready(out_bf16)
    assert out_bf16.shape == (batch, seq, d_model)
    assert jnp.allclose(out_bf16.astype(jnp.float32), ref, atol=2e-1, rtol=2e-1), \
        "bf16 mismatch vs reference"

    # Unaligned d_ff (192 -> zero-padded to 256 inside the wrapper), f32 path.
    d_ff_u = 192
    w1u = jax.random.normal(k4, (d_model, d_ff_u), dtype=jnp.float32) * (d_model ** -0.5)
    w3u = jax.random.normal(k5, (d_model, d_ff_u), dtype=jnp.float32) * (d_model ** -0.5)
    w2u = jax.random.normal(k2, (d_ff_u, d_model), dtype=jnp.float32) * (d_ff_u ** -0.5)
    ref_u = ffn_reference(x, w1u, w3u, w2u)
    out_u = ffn_pallas(x, w1u, w3u, w2u, compute_dtype=jnp.float32)
    out_u = jax.block_until_ready(out_u)
    assert jnp.allclose(out_u, ref_u, atol=2e-5, rtol=2e-5), "padded-d_ff mismatch"

    print("KERNEL_OK")
</pallas_src>

<mosaic_0001>
module attributes {stable_mosaic.version = 11 : i64} {
  func.func @_ffn_kernel(%arg0: i32, %arg1: i32, %arg2: memref<8x128xf32, #tpu.memory_space<vmem>>, %arg3: memref<128x128xf32, #tpu.memory_space<vmem>>, %arg4: memref<128x128xf32, #tpu.memory_space<vmem>>, %arg5: memref<128x128xf32, #tpu.memory_space<vmem>>, %arg6: memref<8x128xf32, #tpu.memory_space<vmem>>, %arg7: memref<8x128xf32, #tpu.memory_space<vmem>>) attributes {dimension_semantics = [#tpu.dimension_semantics<parallel>, #tpu.dimension_semantics<arbitrary>], iteration_bounds = array<i64: 2, 2>, scalar_prefetch = 0 : i64, scratch_operands = 1 : i64, tpu.core_type = #tpu.core_type<tc>, window_params = [{transform_indices = @transform_0, window_bounds = array<i64: 8, 128>}, {transform_indices = @transform_1, window_bounds = array<i64: 128, 128>}, {transform_indices = @transform_2, window_bounds = array<i64: 128, 128>}, {transform_indices = @transform_3, window_bounds = array<i64: 128, 128>}, {transform_indices = @transform_4, window_bounds = array<i64: 8, 128>}]} {
    %c0 = arith.constant 0 : index
    %c0_0 = arith.constant 0 : index
    %0 = vector.load %arg2[%c0, %c0_0] : memref<8x128xf32, #tpu.memory_space<vmem>>, vector<8x128xf32>
    %c0_1 = arith.constant 0 : index
    %c0_2 = arith.constant 0 : index
    %1 = vector.load %arg3[%c0_1, %c0_2] : memref<128x128xf32, #tpu.memory_space<vmem>>, vector<128x128xf32>
    %cst = arith.constant dense<0.000000e+00> : vector<8x128xf32>
    %2 = tpu.matmul %0, %1, %cst {dimension_numbers = #tpu.dot_dimension_numbers<[1], [0], [0], [1], [0, 0, 1, 1], [], []>} : vector<8x128xf32>, vector<128x128xf32>, vector<8x128xf32> -> vector<8x128xf32>
    %c0_3 = arith.constant 0 : index
    %c0_4 = arith.constant 0 : index
    %3 = vector.load %arg4[%c0_3, %c0_4] : memref<128x128xf32, #tpu.memory_space<vmem>>, vector<128x128xf32>
    %cst_5 = arith.constant dense<0.000000e+00> : vector<8x128xf32>
    %4 = tpu.matmul %0, %3, %cst_5 {dimension_numbers = #tpu.dot_dimension_numbers<[1], [0], [0], [1], [0, 0, 1, 1], [], []>} : vector<8x128xf32>, vector<128x128xf32>, vector<8x128xf32> -> vector<8x128xf32>
    %5 = arith.negf %2 : vector<8x128xf32>
    %6 = math.exp %5 : vector<8x128xf32>
    %cst_6 = arith.constant 1.000000e+00 : f32
    %7 = vector.broadcast %cst_6 : f32 to vector<8x128xf32>
    %8 = arith.addf %7, %6 : vector<8x128xf32>
    %9 = arith.divf %7, %8 : vector<8x128xf32>
    %10 = arith.mulf %2, %9 : vector<8x128xf32>
    %11 = arith.mulf %10, %4 : vector<8x128xf32>
    %c0_7 = arith.constant 0 : index
    %c0_8 = arith.constant 0 : index
    %12 = vector.load %arg5[%c0_7, %c0_8] : memref<128x128xf32, #tpu.memory_space<vmem>>, vector<128x128xf32>
    %cst_9 = arith.constant dense<0.000000e+00> : vector<8x128xf32>
    %13 = tpu.matmul %11, %12, %cst_9 {dimension_numbers = #tpu.dot_dimension_numbers<[1], [0], [0], [1], [0, 0, 1, 1], [], []>} : vector<8x128xf32>, vector<128x128xf32>, vector<8x128xf32> -> vector<8x128xf32>
    %c0_i32 = arith.constant 0 : i32
    %14 = arith.cmpi eq, %arg1, %c0_i32 : i32
    %15 = arith.extui %14 : i1 to i32
    %c0_i32_10 = arith.constant 0 : i32
    %16 = arith.cmpi ne, %15, %c0_i32_10 : i32
    scf.if %16 {
      %c0_14 = arith.constant 0 : index
      %c0_15 = arith.constant 0 : index
      %23 = vector.load %arg7[%c0_14, %c0_15] : memref<8x128xf32, #tpu.memory_space<vmem>>, vector<8x128xf32>
      tpu.vector_store %arg7[%c0_14, %c0_15], %13 {strides = array<i32>} : memref<8x128xf32, #tpu.memory_space<vmem>>, vector<8x128xf32>,
    } else {
    }
    %c0_i32_11 = arith.constant 0 : i32
    %17 = arith.cmpi sgt, %arg1, %c0_i32_11 : i32
    %18 = arith.extui %17 : i1 to i32
    %c0_i32_12 = arith.constant 0 : i32
    %19 = arith.cmpi ne, %18, %c0_i32_12 : i32
    scf.if %19 {
      %c0_14 = arith.constant 0 : index
      %c0_15 = arith.constant 0 : index
      %23 = vector.load %arg7[%c0_14, %c0_15] : memref<8x128xf32, #tpu.memory_space<vmem>>, vector<8x128xf32>
      %24 = arith.addf %23, %13 : vector<8x128xf32>
      %c0_16 = arith.constant 0 : index
      %c0_17 = arith.constant 0 : index
      %25 = vector.load %arg7[%c0_16, %c0_17] : memref<8x128xf32, #tpu.memory_space<vmem>>, vector<8x128xf32>
      tpu.vector_store %arg7[%c0_16, %c0_17], %24 {strides = array<i32>} : memref<8x128xf32, #tpu.memory_space<vmem>>, vector<8x128xf32>,
    } else {
    }
    %c1_i32 = arith.constant 1 : i32
    %20 = arith.cmpi eq, %arg1, %c1_i32 : i32
    %21 = arith.extui %20 : i1 to i32
    %c0_i32_13 = arith.constant 0 : i32
    %22 = arith.cmpi ne, %21, %c0_i32_13 : i32
    scf.if %22 {
      %c0_14 = arith.constant 0 : index
      %c0_15 = arith.constant 0 : index
      %23 = vector.load %arg7[%c0_14, %c0_15] : memref<8x128xf32, #tpu.memory_space<vmem>>, vector<8x128xf32>
      %c0_16 = arith.constant 0 : index
      %c0_17 = arith.constant 0 : index
      %24 = vector.load %arg6[%c0_16, %c0_17] : memref<8x128xf32, #tpu.memory_space<vmem>>, vector<8x128xf32>
      tpu.vector_store %arg6[%c0_16, %c0_17], %23 {strides = array<i32>} : memref<8x128xf32, #tpu.memory_space<vmem>>, vector<8x128xf32>,
    } else {
    }
    return
  }
  func.func @transform_0(%arg0: i32, %arg1: i32) -> (i32, i32) {
    %c0_i32 = arith.constant 0 : i32
    %c0_i32_0 = arith.constant 0 : i32
    return %arg0, %c0_i32 : i32, i32
  }
  func.func @transform_1(%arg0: i32, %arg1: i32) -> (i32, i32) {
    %c0_i32 = arith.constant 0 : i32
    %c0_i32_0 = arith.constant 0 : i32
    return %c0_i32, %arg1 : i32, i32
  }
  func.func @transform_2(%arg0: i32, %arg1: i32) -> (i32, i32) {
    %c0_i32 = arith.constant 0 : i32
    %c0_i32_0 = arith.constant 0 : i32
    return %c0_i32, %arg1 : i32, i32
  }
  func.func @transform_3(%arg0: i32, %arg1: i32) -> (i32, i32) {
    %c0_i32 = arith.constant 0 : i32
    %c0_i32_0 = arith.constant 0 : i32
    return %arg1, %c0_i32 : i32, i32
  }
  func.func @transform_4(%arg0: i32, %arg1: i32) -> (i32, i32) {
    %c0_i32 = arith.constant 0 : i32
    %c0_i32_0 = arith.constant 0 : i32
    return %arg0, %c0_i32 : i32, i32
  }
}

</mosaic_0001>

<bundles_post_ra>
// kernel: ffn_pallas.1
= control target key start
LH: loop header
LB: loop body
LE: loop exit
PB: predicated region body
PF: predicated region fallthrough
CT: control target
= control target key end

     0   :  { %s1783_s0 = inlined_call_operand.hbm [shape: f32[16,128], index: 0, kind: input, shape index: {}]   ;;  %s1784_s1 = inlined_call_operand.hbm [shape: f32[128,256], index: 1, kind: input, shape index: {}]   ;;  %s1785_s2 = inlined_call_operand.hbm [shape: f32[128,256], index: 2, kind: input, shape index: {}]   ;;  %s1786_s3 = inlined_call_operand.hbm [shape: f32[256,128], index: 3, kind: input, shape index: {}]   ;;  %s1787_s4 = inlined_call_operand.hbm [shape: f32[16,128], index: 4, kind: output, shape index: {}]  }
   0x1   :  { %1807 = sst [smem:[#allocation25_spill]] %s1783_s0 }
   0x2   :  { %1808 = sst [smem:[#allocation26_spill]] %s1784_s1 }
   0x3   :  { %1809 = sst [smem:[#allocation27_spill]] %s1785_s2 }
   0x4   :  { %1810 = sst [smem:[#allocation28_spill]] %s1787_s4 }
   0x5   :  { %9 = vsyncpa [#allocation4], 0 }
   0x6   :  { %11 = vsyncpa [#allocation4 + $0x1], 0 }
   0x7   :  { %12 = vsyncpa [#allocation7], 0 }
   0x8   :  { %14 = vsyncpa [#allocation7 + $0x1], 0 }
   0x9   :  { %15 = vsyncpa [#allocation10], 0 }
   0xa   :  { %17 = vsyncpa [#allocation10 + $0x1], 0 }
   0xb   :  { %18 = vsyncpa [#allocation5], 0 }
   0xc   :  { %20 = vsyncpa [#allocation5 + $0x1], 0  ;;  %s1374_s15 = smov 0   ;;  %s1376_s16 = smov 0  }
   0xd   :  { %s1378_s17 = smov 0   ;;  %s1380_s18 = smov 0  }
   0xe   :  { %s1382_s19 = smov 0   ;;  %s1384_s20 = smov 0  }
   0xf   :  { %s1386_s21 = smov 0   ;;  %s1388_s22 = smov 0  }
  0x10   :  { %s1390_s23 = smov 0   ;;  %s1392_s24 = smov 0  }
  0x11   :  { %s1394_s25 = smov 0  }
  0x12 LB: > { %1811 = sst [smem:[#allocation16_spill]] %s1309_s18  ;;  %p53_p0 = scmp.eq.s32.totalorder %s1337_s25, 0  ;;  %s1337_s25 = sphi %s1394_s25, %s26_s25   ;;  %s1333_s24 = sphi %s1392_s24, %s1853_s24   ;;  %s1329_s23 = sphi %s1390_s23, %s1861_s23   ;;  %s1325_s22 = sphi %s1388_s22, %s1851_s22   ;;  %s1321_s21 = sphi %s1386_s21, %s1860_s21   ;;  %s1317_s20 = sphi %s1384_s20, %s1859_s20   ;;  %s1313_s19 = sphi %s1382_s19, %s1858_s19   ;;  %s1309_s18 = sphi %s1380_s18, %s1857_s18   ;;  %s1305_s17 = sphi %s1378_s17, %s1856_s17   ;;  %s1301_s16 = sphi %s1376_s16, %s1855_s16   ;;  %s1297_s15 = sphi %s1374_s15, %s1854_s15  }
  0x13   : > { %1812 = sst [smem:[#allocation17_spill]] %s1325_s22  ;;  %p78_p1 = scmp.ne.s32.totalorder %s1305_s17, %s1301_s16 }
  0x14   : > { %1813 = sst [smem:[#allocation18_spill]] %s1333_s24  ;;  %p1795_p2 = scmp.lt.s32.totalorder %s1337_s25, 4 }
  0x15   : > { %s204_s27 = sand.u32 1, %s1337_s25   ;;  %p80_p3 = por %p78_p1, %p53_p0 }
  0x16   : > { %s1788_s28 = sand.u32 1, %s1305_s17   ;;  %s794_s29 = sshll.u32 %s1329_s23, 7 }
  0x17   : > { %s1441_s30 = sshll.u32 %s1788_s28, 7  ;;  %s1814_s1 = sld [smem:[#allocation26_spill]] }
  0x18   : > { %p1450_p4 = pnand %p1795_p2, %p80_p3  ;;  %s208_s9 = scalar_lea.vmem [#allocation6], %s1441_s30 }
  0x19   : > { %s214_s10 = sshll.u32 %s208_s9, 4  ;;  %s1455_s11 = scalar_lea.sflag [#allocation7], %s204_s27  ;;  %s215_s10 = int_to_ptr.vmem [resolvable:$true] %s214_s10 }
  0x1a   : > { %p1794_p5 = pneg %p1450_p4  ;;  %s1110_s12 = scalar_lea.vmem %s215_s10, 2048 }
  0x1b   : > { %p1111_p6 = scmp.ne.s32.totalorder %s215_s10, %s1110_s12  ;;  %s1339_s13 = smov [#allocation6]  }
  0x1c   : > { %s1115_s14 = sshll.u32 %s1339_s13, 4  ;;  %s1116_s14 = int_to_ptr.vmem [resolvable:$false] %s1115_s14 }
  0x1d   : > { %s213_s7 = scalar_lea.hbm %s1814_s1, %s794_s29  ;;  %p1113_p7 = pnand %p1111_p6, %p1794_p5 }
  0x1e   : > { %s1117_s5 = scalar_lea.vmem %s1116_s14, 4096  ;;  %p1118_p9 = scmp.lt.s32.totalorder %s215_s10, %s1116_s14 }
  0x1f   : > { %p1114_p8 = pneg %p1113_p7  ;;  %p1119_p10 = scmp.lt.s32.totalorder %s1117_s5, %s1110_s12 }
  0x21   : > { %p1120_p11 = por %p1119_p10, %p1118_p9 }
  0x23   : > { %p1121_p12 = pnand %p1120_p11, %p1114_p8 }
  0x25   : > { %1124 = shalt.err (!%p1121_p12)
}
  0x26   : > { %s1789_s6 = smov 256   ;;  %s1790_s27 = smov 128  }
  0x27   : > { %s1792_s9 = smov 8   ;;  %s1816_s2 = sld [smem:[#allocation27_spill]] }
  0x28   : > { %987 = dma.hbm_to_vmem [thread:$0]  (!%p1450_p4), %s213_s7, 2048, %s215_s10, %s1455_s11, %s1789_s6, %s1790_s27, %s1792_s9  }
  0x29   : > { %p800_p13 = scmp.ge.s32.totalorder %s1337_s25, 1  ;;  %p263_p1 = scmp.lt.s32.totalorder %s1337_s25, 5 }
  0x2a   : > { %s1482_s28 = sadd.s32 4294967295, %s1337_s25   ;;  %s788_s26 = sadd.s32 4294967294, %s1337_s25  }
  0x2b   : > { %p1477_p3 = pnand %p800_p13, %p263_p1  ;;  %s35_s7 = sadd.s32 1, %s1329_s23 }
  0x2c   : > { %s38_s10 = sadd.s32 1, %s1333_s24  ;;  %p36_p6 = scmp.ge.s32.totalorder %s35_s7, 2 }
  0x2d   : > { %s1473_s14 = scalar_lea.hbm %s1816_s2, %s794_s29  ;;  %s45_s29 = sadd.s32 1, %s1317_s20 }
  0x2e   : > { %p52_p7 = scmp.ne.s32.totalorder %s1317_s20, %s1313_s19  ;;  %p58_p8 = scmp.ne.s32.totalorder %s1313_s19, %s1309_s18 }
  0x2f   : > { %s1863_s7 = smov (%p36_p6, %s35_s7), 0  ;;  %s1865_s10 = smov (!%p36_p6, %s38_s10), %s1333_s24 }
  0x30   : > { %1818 = sst [smem:[#allocation19_spill]] %s1863_s7  ;;  %p1500_p9 = por %p53_p0, %p52_p7 }
  0x31   : > { %p59_p10 = scmp.eq.s32.totalorder %s1482_s28, 0  ;;  %p40_p11 = scmp.ge.s32.totalorder %s1865_s10, 2 }
  0x32   : > { %s68_s13 = ssub.s32 %s1329_s23, %s1863_s7  ;;  %s1822_s27 = sadd.s32 1, %s1305_s17 }
  0x33   : > { %p1510_p12 = por %p59_p10, %p58_p8  ;;  %p69_p13 = scmp.eq.s32.totalorder %s68_s13, 0 }
  0x34   : > { %s1867_s10 = smov (%p40_p11, %s1865_s10), 0  ;;  %p84_p0 = scmp.ne.s32.totalorder %s1301_s16, %s1297_s15 }
  0x35   : > { %s1820_s6 = scalar_select %p1510_p12, 1, 0 }
  0x36   : > { %1821 = sst [smem:[#allocation20_spill]] %s1867_s10  ;;  %s42_s1 = ssub.s32 %s1333_s24, %s1867_s10 }
  0x37   : > { %s1519_s9 = scalar_select %p69_p13, %s1305_s17, %s1822_s27  }
  0x38   : > { %p43_p1 = scmp.eq.s32.totalorder %s42_s1, 0  ;;  %p160_p6 = scmp.eq.s32.totalorder %s1482_s28, 3 }
  0x39   : > { %1823 = sst [smem:[#allocation21_spill]] %s1519_s9  ;;  %p1526_p5 = por %p84_p0, %p59_p10 }
  0x3a   : > { %p166_p2 = scmp.eq.s32.totalorder %s788_s26, 3  ;;  %p1536_p11 = por %p160_p6, %p52_p7 }
  0x3b   : > { %s1824_s2 = scalar_select %p1526_p5, 1, 0 }
  0x3c   : > { %s1531_s7 = scalar_select %p43_p1, %s1317_s20, %s45_s29  }
  0x3d   : > { %s1826_s13 = scalar_select %p1536_p11, 1, 0 }
  0x3e   : > { %1825 = sst [smem:[#allocation22_spill]] %s1531_s7  ;;  %p1543_p13 = por %p166_p2, %p58_p8 }
  0x3f   : > { %1827 = sst [smem:[#allocation23_spill]] %s1826_s13  ;;  %s186_s15 = sand.u32 1, %s1317_s20  }
  0x40   : > { %s1828_s27 = scalar_select %p1543_p13, 1, 0 }
  0x41   : > { %s792_s1 = sshll.u32 %s1333_s24, 7  ;;  %s791_s10 = sshll.u32 %s186_s15, 3 }
  0x42   : > { %1829 = sst [smem:[#allocation24_spill]] %s1828_s27  ;;  %s190_s26 = scalar_lea.vmem [#allocation3], %s791_s10 }
  0x43   : > { %s1830_s0 = sld [smem:[#allocation25_spill]]  ;;  %s197_s29 = sshll.u32 %s190_s26, 4  ;;  %s198_s29 = int_to_ptr.vmem [resolvable:$true] %s197_s29 }
  0x44   : > { %p1831_p10 = scmp.lt.s32.totalorder %s1337_s25, 4  ;;  %s228_s18 = scalar_lea.vmem [#allocation8], %s1441_s30 }
  0x45   : > { %s234_s13 = sshll.u32 %s228_s18, 4  ;;  %s187_s27 = scalar_lea.sflag [#allocation4], %s186_s15  ;;  %s235_s13 = int_to_ptr.vmem [resolvable:$true] %s234_s13 }
  0x46   : > { %p1556_p7 = pnand %p1831_p10, %p1500_p9  ;;  %s1138_s24 = scalar_lea.vmem %s198_s29, 128 }
  0x47   : > { %p1139_p8 = scmp.ne.s32.totalorder %s198_s29, %s1138_s24  ;;  %s1343_s4 = smov [#allocation3]  }
  0x48   : > { %p1127_p2 = pneg %p1556_p7  ;;  %s1143_s9 = sshll.u32 %s1343_s4, 4  ;;  %s1144_s9 = int_to_ptr.vmem [resolvable:$false] %s1143_s9 }
  0x49   : > { %s195_s22 = scalar_lea.hbm %s1830_s0, %s792_s1  ;;  %s1145_s10 = scalar_lea.vmem %s1144_s9, 256 }
  0x4a   : > { %p1141_p0 = pnand %p1139_p8, %p1127_p2  ;;  %p1146_p6 = scmp.lt.s32.totalorder %s198_s29, %s1144_s9 }
  0x4b   : > { %p1147_p9 = scmp.lt.s32.totalorder %s1145_s10, %s1138_s24 }
  0x4c   : > { %p1142_p1 = pneg %p1141_p0 }
  0x4d   : > { %p1148_p10 = por %p1147_p9, %p1146_p6 }
  0x4f   : > { %p1149_p13 = pnand %p1148_p10, %p1142_p1 }
  0x51   : > { %1152 = shalt.err (!%p1149_p13)
}
  0x52   : > { %984 = dma.hbm_to_vmem [thread:$0]  (!%p1556_p7), %s195_s22, 128, %s198_s29, %s187_s27  }
  0x53   : > { %s1166_s18 = scalar_lea.vmem %s235_s13, 2048  ;;  %p1833_p5 = pneg %p1450_p4 }
  0x54   : > { %p1167_p11 = scmp.ne.s32.totalorder %s235_s13, %s1166_s18  ;;  %s1344_s12 = smov [#allocation8]  }
  0x55   : > { %s1171_s15 = sshll.u32 %s1344_s12, 4  ;;  %s1172_s15 = int_to_ptr.vmem [resolvable:$false] %s1171_s15 }
  0x56   : > { %p1169_p2 = pnand %p1167_p11, %p1833_p5  ;;  %s1173_s1 = scalar_lea.vmem %s1172_s15, 4096 }
  0x57   : > { %p1174_p0 = scmp.lt.s32.totalorder %s235_s13, %s1172_s15  ;;  %p1175_p12 = scmp.lt.s32.totalorder %s1173_s1, %s1166_s18 }
  0x58   : > { %p1170_p8 = pneg %p1169_p2 }
  0x59   : > { %p1176_p6 = por %p1175_p12, %p1174_p0 }
  0x5b   : > { %p1177_p1 = pnand %p1176_p6, %p1170_p8 }
  0x5d   : > { %1180 = shalt.err (!%p1177_p1)
}
  0x5e   : > { %s1834_s24 = smov 8   ;;  %s1835_s22 = smov 128  }
  0x5f   : > { %s1836_s7 = smov 256   ;;  %s814_s27 = sshll.u32 %s1329_s23, 11 }
  0x60   : > { %990 = dma.hbm_to_vmem [thread:$0]  (!%p1450_p4), %s1473_s14, 2048, %s235_s13, %s1455_s11, %s1836_s7, %s1835_s22, %s1834_s24  }
  0x61   : > { %s254_s4 = scalar_lea.hbm %s1786_s3, %s814_s27  ;;  %s248_s9 = scalar_lea.vmem [#allocation9], %s1441_s30 }
  0x62   : > { %s255_s10 = sshll.u32 %s248_s9, 4  ;;  %s1837_s18 = sand.u32 1, %s1305_s17   ;;  %s256_s10 = int_to_ptr.vmem [resolvable:$true] %s255_s10 }
  0x63   : > { %s245_s12 = scalar_lea.sflag [#allocation10], %s1837_s18  ;;  %s1194_s15 = scalar_lea.vmem %s256_s10, 2048 }
  0x64   : > { %p1195_p5 = scmp.ne.s32.totalorder %s256_s10, %s1194_s15  ;;  %p1838_p12 = pneg %p1450_p4 }
  0x65   : > { %s1345_s1 = smov [#allocation9]  }
  0x66   : > { %p1197_p11 = pnand %p1195_p5, %p1838_p12  ;;  %s1199_s0 = sshll.u32 %s1345_s1, 4  ;;  %s1200_s0 = int_to_ptr.vmem [resolvable:$false] %s1199_s0 }
  0x67   : > { %s1201_s11 = scalar_lea.vmem %s1200_s0, 4096  ;;  %p1202_p7 = scmp.lt.s32.totalorder %s256_s10, %s1200_s0 }
  0x68   : > { %p1198_p13 = pneg %p1197_p11  ;;  %p1203_p9 = scmp.lt.s32.totalorder %s1201_s11, %s1194_s15 }
  0x6a   : > { %p1204_p10 = por %p1203_p9, %p1202_p7 }
  0x6c   : > { %p1205_p2 = pnand %p1204_p10, %p1198_p13 }
  0x6e   : > { %1208 = shalt.err (!%p1205_p2)
}
  0x6f   : > { %993 = dma.hbm_to_vmem [thread:$0]  (!%p1450_p4), %s254_s4, 2048, %s256_s10, %s245_s12, %s1835_s22, %s1835_s22, %s1834_s24  }
  0x70   : > { %267 = sbr.rel (%p1477_p3) target bundleno = 632 (0x278), region = 36  ;;  %s1593_s30 = sand.u32 (!%p1477_p3), 1, %s1313_s19  }
  0x71   : > { %s801_s0 = sshll.u32 (!%p1477_p3), %s1593_s30, 3  ;;  %s270_s14 = scalar_lea.sflag (!%p1477_p3), [#allocation4], %s1593_s30 }
  0x72   : > { %s1599_s13 = scalar_lea.vmem (!%p1477_p3), [#allocation3], %s801_s0  ;;  %p1839_p8 = scmp.ne.s32.totalorder (!%p1477_p3), %s1820_s6, 0 }
  0x75   : > { %1280 = dma.done.wait (%p1839_p8), %s270_s14, 128  }
  0x76   : > { %1282 = vsyncadd (%p1839_p8), %s270_s14, 4294967168  ;;  %s278_s8 = sand.u32 1, %s1482_s28   ;;  %s280_s5 = sand.u32 1, %s1301_s16  }
  0x77   : > { %s802_s24 = sshll.u32 %s280_s5, 7  ;;  %s279_s22 = scalar_lea.sflag [#allocation7], %s278_s8 }
  0x78   : > { %s1607_s7 = scalar_lea.vmem [#allocation6], %s802_s24  ;;  %p1840_p4 = scmp.ne.s32.totalorder %s1824_s2, 0 }
  0x7a   : > { %1284 = dma.done.wait (%p1840_p4), %s279_s22, 4096  }
  0x7b   : > { %1286 = vsyncadd (%p1840_p4), %s279_s22, 4294963200  ;;  %s1613_s27 = scalar_lea.vmem [#allocation8], %s802_s24  ;;  %s297_s26 = scalar_lea.sflag [#allocation10], %s280_s5 }
  0x7c   : > { %s1615_s6 = scalar_lea.vmem [#allocation9], %s802_s24 }
  0x7d   : > { %1288 = dma.done.wait (%p1840_p4), %s297_s26, 2048  }
  0x7e   : > { %1290 = vsyncadd (%p1840_p4), %s297_s26, 4294965248  ;;  %v1346_v0 = vmov 0.0   ;;  %vm1347_vm0 = vmmov 0   ;;  %v357_v1 = vld [vmem:[%s1607_s7 + $0x78] sm:$0xff]  ;;  %v356_v2 = vld [vmem:[%s1607_s7 + $0x70] sm:$0xff]  ;;  %s339_s2 = scalar_lea.vmem [#allocation11], %s801_s0 }
  0x7f   : > { %866 = vmatprep.subr.mxu0 %v1346_v0  ;;  %898 = vmatprep.mubr.msk.f32.mxu0 %vm1347_vm0, %v1346_v0  ;;  %v355_v3 = vld [vmem:[%s1607_s7 + $0x68] sm:$0xff]  ;;  %v354_v4 = vld [vmem:[%s1607_s7 + $0x60] sm:$0xff]  ;;  %v443_v5 = vld [vmem:[%s1613_s27 + $0x78] sm:$0xff]  ;;  %p807_p3 = scmp.ne.s32.totalorder %s1321_s21, 0 }
  0x80   : > { %901 = vmatprep.subr.mxu1 %v1346_v0  ;;  %933 = vmatprep.mubr.msk.f32.mxu1 %vm1347_vm0, %v1346_v0  ;;  %v353_v6 = vld [vmem:[%s1607_s7 + $0x58] sm:$0xff]  ;;  %v442_v7 = vld [vmem:[%s1613_s27 + $0x70] sm:$0xff]  ;;  %v441_v8 = vld [vmem:[%s1613_s27 + $0x68] sm:$0xff] }
  0x81   : > { %867 = vmatpush3.msra.mxu0 %v357_v1  ;;  %902 = vmatpush3.msra.mxu1 %v443_v5  ;;  %v352_v9 = vld [vmem:[%s1607_s7 + $0x50] sm:$0xff]  ;;  %v440_v10 = vld [vmem:[%s1613_s27 + $0x60] sm:$0xff]  ;;  %v351_v11 = vld [vmem:[%s1607_s7 + $0x48] sm:$0xff] }
  0x82   : > { %868 = vmatprep.subr.mxu0 %v1346_v0  ;;  %903 = vmatprep.subr.mxu1 %v1346_v0  ;;  %v439_v12 = vld [vmem:[%s1613_s27 + $0x58] sm:$0xff]  ;;  %v350_v13 = vld [vmem:[%s1607_s7 + $0x40] sm:$0xff]  ;;  %v438_v14 = vld [vmem:[%s1613_s27 + $0x50] sm:$0xff] }
  0x83   : > { %869 = vmatpush3.msra.mxu0 %v356_v2  ;;  %904 = vmatpush3.msra.mxu1 %v442_v7  ;;  %v349_v15 = vld [vmem:[%s1607_s7 + $0x38] sm:$0xff]  ;;  %v437_v16 = vld [vmem:[%s1613_s27 + $0x48] sm:$0xff]  ;;  %v348_v17 = vld [vmem:[%s1607_s7 + $0x30] sm:$0xff] }
  0x84   : > { %870 = vmatprep.subr.mxu0 %v1346_v0  ;;  %905 = vmatprep.subr.mxu1 %v1346_v0  ;;  %v436_v18 = vld [vmem:[%s1613_s27 + $0x40] sm:$0xff]  ;;  %v347_v19 = vld [vmem:[%s1607_s7 + $0x28] sm:$0xff]  ;;  %v435_v20 = vld [vmem:[%s1613_s27 + $0x38] sm:$0xff] }
  0x85   : > { %871 = vmatpush3.msra.mxu0 %v355_v3  ;;  %906 = vmatpush3.msra.mxu1 %v441_v8  ;;  %v346_v21 = vld [vmem:[%s1607_s7 + $0x20] sm:$0xff]  ;;  %v434_v22 = vld [vmem:[%s1613_s27 + $0x30] sm:$0xff]  ;;  %v345_v23 = vld [vmem:[%s1607_s7 + $0x18] sm:$0xff] }
  0x86   : > { %872 = vmatprep.subr.mxu0 %v1346_v0  ;;  %907 = vmatprep.subr.mxu1 %v1346_v0  ;;  %v433_v24 = vld [vmem:[%s1613_s27 + $0x28] sm:$0xff]  ;;  %v344_v25 = vld [vmem:[%s1607_s7 + $0x10] sm:$0xff]  ;;  %v432_v26 = vld [vmem:[%s1613_s27 + $0x20] sm:$0xff] }
  0x87   : > { %873 = vmatpush3.msra.mxu0 %v354_v4  ;;  %908 = vmatpush3.msra.mxu1 %v440_v10  ;;  %v343_v27 = vld [vmem:[%s1607_s7 + $0x8] sm:$0xff]  ;;  %v431_v28 = vld [vmem:[%s1613_s27 + $0x18] sm:$0xff]  ;;  %v342_v29 = vld [vmem:[%s1607_s7] sm:$0xff] }
  0x88   : > { %874 = vmatprep.subr.mxu0 %v1346_v0  ;;  %909 = vmatprep.subr.mxu1 %v1346_v0  ;;  %v341_v30 = vld [vmem:[%s1599_s13] sm:$0xff]  ;;  %v429_v32 = vld [vmem:[%s1613_s27 + $0x8] sm:$0xff]  ;;  %v428_v33 = vld [vmem:[%s1613_s27] sm:$0xff] }
  0x89   : > { %875 = vmatpush3.msra.mxu0 %v353_v6  ;;  %910 = vmatpush3.msra.mxu1 %v439_v12  ;;  %v430_v31 = vld [vmem:[%s1613_s27 + $0x10] sm:$0xff]  ;;  %v537_v34 = vld [vmem:[%s1615_s6 + $0x78] sm:$0xff]  ;;  %v535_v36 = vld [vmem:[%s1615_s6 + $0x68] sm:$0xff] }
  0x8a   : > { %876 = vmatprep.subr.mxu0 %v1346_v0  ;;  %911 = vmatprep.subr.mxu1 %v1346_v0  ;;  %v536_v35 = vld [vmem:[%s1615_s6 + $0x70] sm:$0xff]  ;;  %v534_v37 = vld [vmem:[%s1615_s6 + $0x60] sm:$0xff]  ;;  %v533_v38 = vld [vmem:[%s1615_s6 + $0x58] sm:$0xff] }
  0x8b   : > { %877 = vmatpush3.msra.mxu0 %v352_v9  ;;  %912 = vmatpush3.msra.mxu1 %v438_v14  ;;  %v532_v39 = vld [vmem:[%s1615_s6 + $0x50] sm:$0xff]  ;;  %v531_v40 = vld [vmem:[%s1615_s6 + $0x48] sm:$0xff]  ;;  %v530_v41 = vld [vmem:[%s1615_s6 + $0x40] sm:$0xff] }
  0x8c   : > { %878 = vmatprep.subr.mxu0 %v1346_v0  ;;  %913 = vmatprep.subr.mxu1 %v1346_v0  ;;  %v529_v42 = vld [vmem:[%s1615_s6 + $0x38] sm:$0xff]  ;;  %v528_v43 = vld [vmem:[%s1615_s6 + $0x30] sm:$0xff]  ;;  %v527_v44 = vld [vmem:[%s1615_s6 + $0x28] sm:$0xff] }
  0x8d   : > { %879 = vmatpush3.msra.mxu0 %v351_v11  ;;  %914 = vmatpush3.msra.mxu1 %v437_v16  ;;  %v526_v45 = vld [vmem:[%s1615_s6 + $0x20] sm:$0xff]  ;;  %v525_v46 = vld [vmem:[%s1615_s6 + $0x18] sm:$0xff]  ;;  %v524_v47 = vld [vmem:[%s1615_s6 + $0x10] sm:$0xff] }
  0x8e   : > { %880 = vmatprep.subr.mxu0 %v1346_v0  ;;  %915 = vmatprep.subr.mxu1 %v1346_v0  ;;  %v523_v48 = vld [vmem:[%s1615_s6 + $0x8] sm:$0xff]  ;;  %v522_v49 = vld [vmem:[%s1615_s6] sm:$0xff] }
  0x8f   : > { %881 = vmatpush3.msra.mxu0 %v350_v13  ;;  %916 = vmatpush3.msra.mxu1 %v436_v18 }
  0x90   : > { %882 = vmatprep.subr.mxu0 %v1346_v0  ;;  %917 = vmatprep.subr.mxu1 %v1346_v0 }
  0x91   : > { %883 = vmatpush3.msra.mxu0 %v349_v15  ;;  %918 = vmatpush3.msra.mxu1 %v435_v20 }
  0x92   : > { %884 = vmatprep.subr.mxu0 %v1346_v0  ;;  %919 = vmatprep.subr.mxu1 %v1346_v0 }
  0x93   : > { %885 = vmatpush3.msra.mxu0 %v348_v17  ;;  %920 = vmatpush3.msra.mxu1 %v434_v22 }
  0x94   : > { %886 = vmatprep.subr.mxu0 %v1346_v0  ;;  %921 = vmatprep.subr.mxu1 %v1346_v0 }
  0x95   : > { %887 = vmatpush3.msra.mxu0 %v347_v19  ;;  %922 = vmatpush3.msra.mxu1 %v433_v24 }
  0x96   : > { %888 = vmatprep.subr.mxu0 %v1346_v0  ;;  %923 = vmatprep.subr.mxu1 %v1346_v0 }
  0x97   : > { %889 = vmatpush3.msra.mxu0 %v346_v21  ;;  %924 = vmatpush3.msra.mxu1 %v432_v26 }
  0x98   : > { %890 = vmatprep.subr.mxu0 %v1346_v0  ;;  %925 = vmatprep.subr.mxu1 %v1346_v0 }
  0x99   : > { %891 = vmatpush3.msra.mxu0 %v345_v23  ;;  %926 = vmatpush3.msra.mxu1 %v431_v28 }
  0x9a   : > { %892 = vmatprep.subr.mxu0 %v1346_v0  ;;  %927 = vmatprep.subr.mxu1 %v1346_v0 }
  0x9b   : > { %893 = vmatpush3.msra.mxu0 %v344_v25  ;;  %928 = vmatpush3.msra.mxu1 %v430_v31 }
  0x9c   : > { %894 = vmatprep.subr.mxu0 %v1346_v0  ;;  %929 = vmatprep.subr.mxu1 %v1346_v0 }
  0x9d   : > { %895 = vmatpush3.msra.mxu0 %v343_v27  ;;  %930 = vmatpush3.msra.mxu1 %v429_v32 }
  0x9e   : > { %896 = vmatprep.subr.mxu0 %v1346_v0  ;;  %931 = vmatprep.subr.mxu1 %v1346_v0 }
  0x9f   : > { %897 = vmatpush3.msra.mxu0 %v342_v29  ;;  %932 = vmatpush3.msra.mxu1 %v428_v33 }
  0xa0   : > { %899 = vmatmul.mubr.f32.vlgmr.msra.gmra.mxu0 %v341_v30  ;;  %936 = vmatprep.subr.mxu0 %v1346_v0 }
  0xa1   : > { %968 = vmatprep.mubr.msk.f32.mxu0 %vm1347_vm0, %v1346_v0  ;;  %934 = vmatmul.mubr.f32.vlgmr.msra.gmra.mxu1 %v341_v30 }
  0xa2   : > { %937 = vmatpush3.msra.mxu0 %v537_v34 }
  0xa3   : > { %938 = vmatprep.subr.mxu0 %v1346_v0 }
  0xa4   : > { %939 = vmatpush3.msra.mxu0 %v536_v35 }
  0xa5   : > { %940 = vmatprep.subr.mxu0 %v1346_v0 }
  0xa6   : > { %941 = vmatpush3.msra.mxu0 %v535_v36 }
  0xa7   : > { %942 = vmatprep.subr.mxu0 %v1346_v0 }
  0xa8   : > { %943 = vmatpush3.msra.mxu0 %v534_v37 }
  0xa9   : > { %944 = vmatprep.subr.mxu0 %v1346_v0 }
  0xaa   : > { %945 = vmatpush3.msra.mxu0 %v533_v38 }
  0xab   : > { %946 = vmatprep.subr.mxu0 %v1346_v0 }
  0xac   : > { %947 = vmatpush3.msra.mxu0 %v532_v39 }
  0xad   : > { %948 = vmatprep.subr.mxu0 %v1346_v0 }
  0xae   : > { %949 = vmatpush3.msra.mxu0 %v531_v40 }
  0xaf   : > { %950 = vmatprep.subr.mxu0 %v1346_v0 }
  0xb0   : > { %951 = vmatpush3.msra.mxu0 %v530_v41 }
  0xb1   : > { %952 = vmatprep.subr.mxu0 %v1346_v0 }
  0xb2   : > { %953 = vmatpush3.msra.mxu0 %v529_v42 }
  0xb3   : > { %954 = vmatprep.subr.mxu0 %v1346_v0 }
  0xb4   : > { %955 = vmatpush3.msra.mxu0 %v528_v43 }
  0xb5   : > { %956 = vmatprep.subr.mxu0 %v1346_v0 }
  0xb6   : > { %957 = vmatpush3.msra.mxu0 %v527_v44 }
  0xb7   : > { %958 = vmatprep.subr.mxu0 %v1346_v0 }
  0xb8   : > { %959 = vmatpush3.msra.mxu0 %v526_v45 }
  0xb9   : > { %960 = vmatprep.subr.mxu0 %v1346_v0 }
  0xba   : > { %961 = vmatpush3.msra.mxu0 %v525_v46 }
  0xbb   : > { %962 = vmatprep.subr.mxu0 %v1346_v0 }
  0xbc   : > { %963 = vmatpush3.msra.mxu0 %v524_v47 }
  0xbd   : > { %964 = vmatprep.subr.mxu0 %v1346_v0 }
  0xbe   : > { %965 = vmatpush3.msra.mxu0 %v523_v48 }
  0xbf   : > { %966 = vmatprep.subr.mxu0 %v1346_v0 }
  0xc0   : > { %967 = vmatpush3.msra.mxu0 %v522_v49 }
 0x160   : > { %v424_v50 = vpop.f32.mrf.mxu0 }
 0x161   : > { %v806_v51 = vmul.f32 -1.442695, %v424_v50  ;;  %v510_v53 = vpop.f32.mrf.mxu1 }
 0x162   : > { %v900_v52 = vpop.f32.mrf.mxu0 }
 0x163   : > { %1093 = vpow2.f32 %v806_v51  ;;  %v935_v54 = vpop.f32.mrf.mxu1 }
 0x170   : > { %v1094_v55 = vpop.eup %1093 }
 0x171   : > { %v517_v56 = vadd.f32 1.0, %v1094_v55 }
 0x173   : > { %1095 = vrcp.f32 %v517_v56 }
 0x180   : > { %v1096_v57 = vpop.eup %1095 }
 0x181   : > { %v520_v58 = vmul.f32 %v1096_v57, %v424_v50 }
 0x183   : > { %v521_v59 = vmul.f32 %v520_v58, %v510_v53 }
 0x185   : > { %969 = vmatmul.mubr.f32.vlgmr.msra.gmra.mxu0 %v521_v59 }
 0x243   : > { %611 = sbr.rel (%p807_p3) target bundleno = 585 (0x249), region = 56 }
 0x245   : > { %v604_v60 = vpop.f32.mrf.mxu0 }
 0x247   : > { %v970_v61 = vpop.f32.mrf.mxu0 }
 0x248   : > { %612 = vst [vmem:[#allocation2] sm:$0xff] %v604_v60 }
 0x249 PF: > { %p808_p0 = scmp.le.s32.totalorder %s1321_s21, 0 }
 0x24b   : > { %616 = sbr.rel (%p808_p0) target bundleno = 596 (0x254), region = 60 }
 0x250   : > { %v617_v62 = vld [vmem:[#allocation2] sm:$0xff] }
 0x251   : > { %v618_v63 = vadd.f32 %v617_v62, %v604_v60 }
 0x253   : > { %619 = vst [vmem:[#allocation2] sm:$0xff] %v618_v63 }
 0x254 PF: > { %p809_p6 = scmp.ne.s32.totalorder %s1321_s21, 1 }
 0x256   : > { %623 = sbr.rel (%p809_p6) target bundleno = 605 (0x25d), region = 64 }
 0x25b   : > { %v624_v0 = vld [vmem:[#allocation2] sm:$0xff] }
 0x25c   : > { %625 = vst [vmem:[%s339_s2] sm:$0xff] %v624_v0 }
 0x25d PF: > { %s1841_s28 = sld [smem:[#allocation17_spill]]  ;;  %s640_s1 = sshll.u32 %s339_s2, 4  ;;  %s641_s1 = int_to_ptr.vmem [resolvable:$true] %s640_s1 }
 0x25e   : > { %s1842_s29 = sld [smem:[#allocation23_spill]]  ;;  %s627_s11 = scalar_lea.sflag [#allocation5], %s1593_s30 }
 0x25f   : > { %s1843_s18 = sld [smem:[#allocation28_spill]]  ;;  %s1209_s0 = scalar_lea.vmem %s641_s1, 128 }
 0x260   : > { %p1210_p1 = scmp.ne.s32.totalorder %s641_s1, %s1209_s0  ;;  %s1348_s21 = smov [#allocation11]  }
 0x261   : > { %s1213_s14 = sshll.u32 %s1348_s21, 4  ;;  %s1214_s14 = int_to_ptr.vmem [resolvable:$false] %s1213_s14 }
 0x262   : > { %s1215_s13 = scalar_lea.vmem %s1214_s14, 256  ;;  %p1216_p13 = scmp.lt.s32.totalorder %s641_s1, %s1214_s14 }
 0x263   : > { %s811_s4 = sshll.u32 %s1841_s28, 7  ;;  %p1217_p7 = scmp.lt.s32.totalorder %s1215_s13, %s1209_s0 }
 0x264   : > { %p1845_p5 = scmp.ne.s32.totalorder %s1842_s29, 0 }
 0x265   : > { %s1844_s12 = smov %s1843_s18  ;;  %s638_s15 = scalar_lea.hbm %s1843_s18, %s811_s4 }
 0x266   : > { %p1211_p12 = pnand %p1210_p1, %p1845_p5  ;;  %p1218_p9 = por %p1217_p7, %p1216_p13 }
 0x268   : > { %p1212_p11 = pneg %p1211_p12 }
 0x26a   : > { %p1219_p10 = pnand %p1218_p9, %p1212_p11 }
 0x26c   : > { %1222 = shalt.err (!%p1219_p10)
}
 0x26d   : > { %s1223_s8 = scalar_lea.hbm %s638_s15, 128  ;;  %s1227_s24 = scalar_lea.hbm %s1844_s12, 256 }
 0x26e   : > { %p1224_p2 = scmp.ne.s32.totalorder %s638_s15, %s1223_s8  ;;  %p1228_p3 = scmp.lt.s32.totalorder %s638_s15, %s1844_s12 }
 0x26f   : > { %p1229_p0 = scmp.lt.s32.totalorder %s1227_s24, %s1223_s8 }
 0x270   : > { %p1225_p8 = pnand %p1224_p2, %p1845_p5 }
 0x271   : > { %p1230_p6 = por %p1229_p0, %p1228_p3 }
 0x272   : > { %p1226_p4 = pneg %p1225_p8 }
 0x274   : > { %p1231_p1 = pnand %p1230_p6, %p1226_p4 }
 0x276   : > { %1234 = shalt.err (!%p1231_p1)
}
 0x277   : > { %979 = dma.vmem_to_hbm [thread:$0]  (%p1845_p5), %s641_s1, 128, %s638_s15, %s627_s11  }
 0x278 PF: > { %s1846_s27 = sld [smem:[#allocation16_spill]]  ;;  %p999_p12 = scmp.ge.s32.totalorder %s1337_s25, 2 }
 0x279   : > { %s1847_s26 = sld [smem:[#allocation24_spill]] }
 0x27e   : > { %s652_s6 = sand.u32 1, %s1846_s27  }
 0x27f   : > { %p1848_p11 = scmp.ne.s32.totalorder %s1847_s26, 0  ;;  %s653_s2 = scalar_lea.sflag [#allocation5], %s652_s6 }
 0x281   : > { %p995_p13 = pnand %p999_p12, %p1848_p11 }
 0x283   : > { %p996_p7 = pneg %p995_p13 }
 0x285   : > { %1292 = dma.done.wait (%p996_p7), %s653_s2, 128  }
 0x286   : > { %1294 = vsyncadd (%p996_p7), %s653_s2, 4294967168  ;;  %s26_s25 = sadd.s32 1, %s1337_s25   ;;  %s1849_s28 = sld [smem:[#allocation21_spill]] }
 0x287   : > { %p23_p9 = scmp.ge.s32.totalorder %s26_s25, 6   ;;  %s1850_s29 = sld [smem:[#allocation22_spill]] }
 0x288   : > { %s1851_s22 = sld [smem:[#allocation18_spill]]  ;;  %s1854_s15 = smov %s1301_s16 }
 0x289   : > { %s1852_s4 = sld [smem:[#allocation19_spill]]  ;;  %s1855_s16 = smov %s1305_s17 }
 0x28a   : > { %s1853_s24 = sld [smem:[#allocation20_spill]]  ;;  %s1857_s18 = smov %s1313_s19 }
 0x28b   : > { %s1858_s19 = smov %s1317_s20  ;;  %s1860_s21 = smov %s1329_s23 }
 0x28c   : > { %s1856_s17 = smov %s1849_s28  ;;  %25 = sbr.rel (!%p23_p9) target bundleno = 18 (0x12), region = 130 }
 0x28d   : > { %s1859_s20 = smov %s1850_s29 }
 0x28f   : > { %s1861_s23 = smov %s1852_s4 }
 0x291   :  { %658 = vsyncpa [#allocation4], 1 }
 0x292   :  { %660 = vsyncpa [#allocation4 + $0x1], 1 }
 0x293   :  { %661 = vsyncpa [#allocation7], 1 }
 0x294   :  { %663 = vsyncpa [#allocation7 + $0x1], 1 }
 0x295   :  { %664 = vsyncpa [#allocation10], 1 }
 0x296   :  { %666 = vsyncpa [#allocation10 + $0x1], 1 }
 0x297   :  { %667 = vsyncpa [#allocation5], 1 }
 0x298   :  { %669 = vsyncpa [#allocation5 + $0x1], 1 }

</bundles_post_ra>
